<compile_context>
chip_gen: v5e
topology: v5e:2x2
jax: 0.10.0
libtpu: 0.0.40
codegen_flags: <defaults>
</compile_context>

<pallas_src>
import functools

import jax
import jax.numpy as jnp
from jax.experimental import pallas as pl
from jax.experimental.pallas import tpu as pltpu


# -----------------------------------------------------------------------------
# Fused kernel: gather + convs + max-pool + MLP
# -----------------------------------------------------------------------------
def fused_textcnn_kernel(tok_ref, table_ref, wconv_ref, bconv_ref, mask_ref,
                         w1_ref, b1_ref, w2_ref, b2_ref, out_ref,
                         *, seq_len, compute_dtype):
    f32 = jnp.float32
    cdt = compute_dtype
    L = seq_len
    rows = tok_ref.shape[0]               # batch_tile * L
    bt = rows // L
    vocab = table_ref.shape[0]
    max_k = wconv_ref.shape[0]            # taps
    n_conv = wconv_ref.shape[2]           # lane-padded conv output width (=128)

    # 1) Embedding gather as a one-hot matmul on the MXU (no XLA gather op).
    #    Out-of-range / garbage token ids (possible in a padded last grid step)
    #    match no vocab row -> all-zero embedding; those output rows are
    #    write-masked by Pallas anyway, so this is benign.
    tok = tok_ref[...]                                               # [rows, 1] i32
    vocab_iota = jax.lax.broadcasted_iota(jnp.int32, (rows, vocab), 1)
    onehot = (vocab_iota == tok).astype(cdt)                         # [rows, vocab]
    emb = jnp.dot(onehot, table_ref[...],
                  preferred_element_type=f32)                        # [rows, E] f32

    # 2-3) Per-tap accumulated matmuls: conv[t] = sum_j emb[t + j] @ W_tap_j.
    #    Time shift via XLU sublane roll (no off-8 sublane slices).
    #    INVARIANT: the roll wraps rows across batch elements / past the tile
    #    end; wrapped rows only ever land at time steps t > L - k for the
    #    branches that use tap j, and those positions are sent to -1e30 by the
    #    additive mask below before the max.  Do not change roll direction or
    #    the mask without revisiting this.
    conv = jnp.dot(emb.astype(cdt), wconv_ref[0],
                   preferred_element_type=f32)                       # [rows, N]
    for j in range(1, max_k):
        emb_j = pltpu.roll(emb, shift=rows - j, axis=0).astype(cdt)  # emb[r+j]
        conv = conv + jnp.dot(emb_j, wconv_ref[j], preferred_element_type=f32)
    conv = conv.reshape(bt, L, n_conv)                               # [bt, L, N]

    # 4) Precomputed additive time/branch mask (broadcast over bt), max over t.
    conv = conv + mask_ref[...]                                      # [L, N] mask
    pooled = jnp.max(conv, axis=1)                                   # [bt, N] f32

    # 5) Bias + ReLU after the max (monotone => same as relu-then-maxpool).
    pooled = jnp.maximum(pooled + bconv_ref[...], 0.0)

    # 6) MLP head.  Padded lanes of `pooled` are exactly 0 and W1's padded rows
    #    are 0, so K is a dense 128 lanes; W2/B2 are padded to 128 output lanes
    #    so N and the output store are lane-dense too.
    h = jnp.dot(pooled.astype(cdt), w1_ref[...], preferred_element_type=f32)
    h = jnp.maximum(h + b1_ref[...], 0.0)
    logits = jnp.dot(h.astype(cdt), w2_ref[...], preferred_element_type=f32)
    out_ref[...] = logits + b2_ref[...]


# -----------------------------------------------------------------------------
# Parameter packing (done once, outside the hot path)
# -----------------------------------------------------------------------------
def pack_params(params, *, maxlen, kernel_sizes, compute_dtype=jnp.bfloat16,
                lane=128):
    """Packs PyTorch-style params into lane-dense, kernel-ready operands."""
    emb_tab = params["embedding"]
    vocab, embed = emb_tab.shape
    feat = params["convs"][0][0].shape[2]
    n_branches = len(kernel_sizes)
    max_k = max(kernel_sizes)
    f_total = n_branches * feat
    # Exactly 128 lanes unless the real feature count exceeds it (v5e MXU fit).
    n_conv = max(lane, ((f_total + lane - 1) // lane) * lane)
    v_pad = ((vocab + 7) // 8) * 8

    table = jnp.zeros((v_pad, embed), jnp.float32).at[:vocab].set(emb_tab)

    # w_conv[j, :, i*F:(i+1)*F] = conv_i weight for tap j (zero elsewhere).
    w_conv = jnp.zeros((max_k, embed, n_conv), jnp.float32)
    b_conv = jnp.zeros((1, n_conv), jnp.float32)
    for i, (n, (w, b)) in enumerate(zip(kernel_sizes, params["convs"])):
        for j in range(n):
            w_conv = w_conv.at[j, :, i * feat:(i + 1) * feat].set(w[j])
        b_conv = b_conv.at[:, i * feat:(i + 1) * feat].set(b)

    # Additive time/branch mask: 0 at valid time steps of each branch,
    # -1e30 past that branch's last valid position.  Padded columns stay 0
    # (their conv values are exactly 0, so relu(0 + 0) keeps them 0).
    mask = jnp.zeros((maxlen, n_conv), jnp.float32)
    t = jnp.arange(maxlen)[:, None]
    for i, n in enumerate(kernel_sizes):
        col = jnp.where(t > (maxlen - n), jnp.float32(-1e30), jnp.float32(0.0))
        mask = mask.at[:, i * feat:(i + 1) * feat].set(
            jnp.broadcast_to(col, (maxlen, feat)))

    hidden = params["w1"].shape[1]
    class_num = params["w2"].shape[1]
    out_lanes = max(lane, ((class_num + lane - 1) // lane) * lane)

    w1 = jnp.zeros((n_conv, hidden), jnp.float32).at[:f_total].set(params["w1"])
    w2 = jnp.zeros((hidden, out_lanes), jnp.float32).at[:, :class_num].set(params["w2"])
    b2 = jnp.zeros((1, out_lanes), jnp.float32).at[:, :class_num].set(params["b2"])

    return dict(
        table=table.astype(compute_dtype),
        w_conv=w_conv.astype(compute_dtype),
        b_conv=b_conv,                             # f32 epilogue (v5e-friendly)
        mask=mask,                                 # f32 additive mask
        w1=w1.astype(compute_dtype),
        b1=params["b1"].astype(jnp.float32),
        w2=w2.astype(compute_dtype),
        b2=b2,
    )


# -----------------------------------------------------------------------------
# Forward wrapper: one pallas_call
# -----------------------------------------------------------------------------
def textcnn_forward(tokens, packed, *, maxlen, class_num,
                    compute_dtype=jnp.bfloat16, batch_tile=None):
    """tokens: int32 [B, maxlen] -> logits float32 [B, class_num]."""
    batch, seq = tokens.shape
    assert seq == maxlen, (seq, maxlen)
    if batch_tile is None:
        # rows = batch_tile * L >= 256 fills the MXU M dim on v6e/v7x; for
        # batches larger than one tile the grid has >= 2 steps so the
        # "parallel" axis shards across both v7x TensorCores.
        target = max(1, 256 // seq)
        batch_tile = batch if batch <= target else target
    grid = (pl.cdiv(batch, batch_tile),)
    out_lanes = packed["b2"].shape[1]

    # Tokens as a column vector so the in-kernel one-hot is a plain 2-D compare.
    tok_col = tokens.reshape(batch * seq, 1).astype(jnp.int32)

    kernel = functools.partial(
        fused_textcnn_kernel,
        seq_len=seq,
        compute_dtype=compute_dtype,
    )

    def replicated(arr):      # full-array block, identical for every grid step
        nd = arr.ndim
        return pl.BlockSpec(arr.shape, lambda i, _nd=nd: (0,) * _nd)
        # (weights are constant-index; switch to pipeline_mode=pl.Buffered(1)
        #  only if VMEM gets tight at much larger hidden/vocab.)

    logits_pad = pl.pallas_call(
        kernel,
        out_shape=jax.ShapeDtypeStruct((batch, out_lanes), jnp.float32),
        grid=grid,
        in_specs=[
            pl.BlockSpec((batch_tile * seq, 1), lambda i: (i, 0)),
            replicated(packed["table"]),
            replicated(packed["w_conv"]),
            replicated(packed["b_conv"]),
            replicated(packed["mask"]),
            replicated(packed["w1"]),
            replicated(packed["b1"]),
            replicated(packed["w2"]),
            replicated(packed["b2"]),
        ],
        out_specs=pl.BlockSpec((batch_tile, out_lanes), lambda i: (i, 0)),
        compiler_params=pltpu.CompilerParams(
            dimension_semantics=("parallel",)),
    )(tok_col, packed["table"], packed["w_conv"], packed["b_conv"],
      packed["mask"], packed["w1"], packed["b1"], packed["w2"], packed["b2"])

    return logits_pad[:, :class_num]


# -----------------------------------------------------------------------------
# Deterministic parameter construction (PyTorch-equivalent layout)
# -----------------------------------------------------------------------------
def init_params(key, *, max_features, embedding_dims, feature_size,
                kernel_sizes, class_num, hidden=512):
    n_k = len(kernel_sizes)
    keys = jax.random.split(key, 6 + 2 * n_k)
    params = {}
    params["embedding"] = (
        jax.random.normal(keys[0], (max_features, embedding_dims), jnp.float32) * 0.1)
    convs = []
    for i, n in enumerate(kernel_sizes):
        wk = jax.random.normal(
            keys[1 + 2 * i], (n, embedding_dims, feature_size), jnp.float32) * 0.1
        bk = jax.random.normal(
            keys[2 + 2 * i], (1, feature_size), jnp.float32) * 0.01
        convs.append((wk, bk))
    params["convs"] = convs
    kb = 1 + 2 * n_k
    in_feats = feature_size * n_k
    params["w1"] = jax.random.normal(keys[kb], (in_feats, hidden), jnp.float32) * 0.05
    params["b1"] = jax.random.normal(keys[kb + 1], (1, hidden), jnp.float32) * 0.01
    params["w2"] = jax.random.normal(keys[kb + 2], (hidden, class_num), jnp.float32) * 0.05
    params["b2"] = jax.random.normal(keys[kb + 3], (1, class_num), jnp.float32) * 0.01
    return params


# -----------------------------------------------------------------------------
# Pure-JAX reference (matches the PyTorch forward semantics)
# -----------------------------------------------------------------------------
def textcnn_reference(tokens, params, *, maxlen, kernel_sizes):
    emb = jnp.take(params["embedding"], tokens, axis=0)          # [B, L, E]
    pooled = []
    for n, (w, b) in zip(kernel_sizes, params["convs"]):
        t_out = maxlen - n + 1
        acc = jnp.zeros((emb.shape[0], t_out, w.shape[2]), jnp.float32)
        for j in range(n):
            acc = acc + jnp.einsum("ble,ef->blf", emb[:, j:j + t_out, :], w[j])
        acc = jax.nn.relu(acc + b[0])                            # relu(conv)
        pooled.append(jnp.max(acc, axis=1))                      # maxpool over time
    feats = jnp.concatenate(pooled, axis=1)
    h = jax.nn.relu(feats @ params["w1"] + params["b1"])
    return h @ params["w2"] + params["b2"]


# -----------------------------------------------------------------------------
# Main
# -----------------------------------------------------------------------------
if __name__ == "__main__":
    B = 2
    MAXLEN = 16
    MAX_FEATURES = 50      # vocab size
    EMBED_DIMS = 32
    FEATURE_SIZE = 16
    KERNEL_SIZES = (1, 2, 3)
    CLASS_NUM = 4

    key = jax.random.PRNGKey(0)
    pkey, xkey = jax.random.split(key)

    params = init_params(
        pkey,
        max_features=MAX_FEATURES,
        embedding_dims=EMBED_DIMS,
        feature_size=FEATURE_SIZE,
        kernel_sizes=KERNEL_SIZES,
        class_num=CLASS_NUM,
    )
    tokens = jax.random.randint(xkey, (B, MAXLEN), 0, MAX_FEATURES, dtype=jnp.int32)

    packed = pack_params(params, maxlen=MAXLEN, kernel_sizes=KERNEL_SIZES)

    fwd = jax.jit(functools.partial(
        textcnn_forward, maxlen=MAXLEN, class_num=CLASS_NUM))
    logits = jax.block_until_ready(fwd(tokens, packed))

    ref = textcnn_reference(tokens, params, maxlen=MAXLEN, kernel_sizes=KERNEL_SIZES)

    assert logits.shape == (B, CLASS_NUM), logits.shape
    assert bool(jnp.all(jnp.isfinite(logits)))
    # bf16 matmul operands / f32 accumulation -> small numerical difference.
    assert bool(jnp.allclose(logits, ref, atol=1e-2, rtol=5e-2)), (logits, ref)
    print("KERNEL_OK")
</pallas_src>

<mosaic_0001>
module attributes {stable_mosaic.version = 11 : i64} {
  func.func @fused_textcnn_kernel(%arg0: i32, %arg1: memref<32x1xi32, #tpu.memory_space<vmem>>, %arg2: memref<56x32xbf16, #tpu.memory_space<vmem>>, %arg3: memref<3x32x128xbf16, #tpu.memory_space<vmem>>, %arg4: memref<1x128xf32, #tpu.memory_space<vmem>>, %arg5: memref<16x128xf32, #tpu.memory_space<vmem>>, %arg6: memref<128x512xbf16, #tpu.memory_space<vmem>>, %arg7: memref<1x512xf32, #tpu.memory_space<vmem>>, %arg8: memref<512x128xbf16, #tpu.memory_space<vmem>>, %arg9: memref<1x128xf32, #tpu.memory_space<vmem>>, %arg10: memref<2x128xf32, #tpu.memory_space<vmem>>) attributes {dimension_semantics = [#tpu.dimension_semantics<parallel>], iteration_bounds = array<i64: 1>, scalar_prefetch = 0 : i64, scratch_operands = 0 : i64, tpu.core_type = #tpu.core_type<tc>, window_params = [{transform_indices = @transform_0, window_bounds = array<i64: 32, 1>}, {pipeline_mode = #tpu.pipeline_mode<synchronous>, transform_indices = @transform_1, window_bounds = array<i64: 56, 32>}, {pipeline_mode = #tpu.pipeline_mode<synchronous>, transform_indices = @transform_2, window_bounds = array<i64: 3, 32, 128>}, {pipeline_mode = #tpu.pipeline_mode<synchronous>, transform_indices = @transform_3, window_bounds = array<i64: 1, 128>}, {pipeline_mode = #tpu.pipeline_mode<synchronous>, transform_indices = @transform_4, window_bounds = array<i64: 16, 128>}, {pipeline_mode = #tpu.pipeline_mode<synchronous>, transform_indices = @transform_5, window_bounds = array<i64: 128, 512>}, {pipeline_mode = #tpu.pipeline_mode<synchronous>, transform_indices = @transform_6, window_bounds = array<i64: 1, 512>}, {pipeline_mode = #tpu.pipeline_mode<synchronous>, transform_indices = @transform_7, window_bounds = array<i64: 512, 128>}, {pipeline_mode = #tpu.pipeline_mode<synchronous>, transform_indices = @transform_8, window_bounds = array<i64: 1, 128>}, {transform_indices = @transform_9, window_bounds = array<i64: 2, 128>}]} {
    %c0 = arith.constant 0 : index
    %c0_0 = arith.constant 0 : index
    %0 = vector.load %arg1[%c0, %c0_0] : memref<32x1xi32, #tpu.memory_space<vmem>>, vector<32x1xi32>
    %1 = tpu.iota {dimensions = array<i32: 1>} : vector<32x56xi32>
    %2 = vector.broadcast %0 : vector<32x1xi32> to vector<32x56xi32>
    %3 = arith.cmpi eq, %1, %2 : vector<32x56xi32>
    %4 = arith.extui %3 : vector<32x56xi1> to vector<32x56xi32>
    %5 = arith.sitofp %4 : vector<32x56xi32> to vector<32x56xf32>
    %6 = arith.truncf %5 : vector<32x56xf32> to vector<32x56xbf16>
    %c0_1 = arith.constant 0 : index
    %c0_2 = arith.constant 0 : index
    %7 = vector.load %arg2[%c0_1, %c0_2] : memref<56x32xbf16, #tpu.memory_space<vmem>>, vector<56x32xbf16>
    %cst = arith.constant dense<0.000000e+00> : vector<32x32xf32>
    %8 = tpu.matmul %6, %7, %cst {dimension_numbers = #tpu.dot_dimension_numbers<[1], [0], [0], [1], [0, 0, 1, 1], [], []>} : vector<32x56xbf16>, vector<56x32xbf16>, vector<32x32xf32> -> vector<32x32xf32>
    %9 = arith.truncf %8 : vector<32x32xf32> to vector<32x32xbf16>
    %c0_3 = arith.constant 0 : index
    %c0_4 = arith.constant 0 : index
    %c0_5 = arith.constant 0 : index
    %10 = vector.load %arg3[%c0_3, %c0_4, %c0_5] : memref<3x32x128xbf16, #tpu.memory_space<vmem>>, vector<1x32x128xbf16>
    %11 = vector.shape_cast %10 : vector<1x32x128xbf16> to vector<32x128xbf16>
    %cst_6 = arith.constant dense<0.000000e+00> : vector<32x128xf32>
    %12 = tpu.matmul %9, %11, %cst_6 {dimension_numbers = #tpu.dot_dimension_numbers<[1], [0], [0], [1], [0, 0, 1, 1], [], []>} : vector<32x32xbf16>, vector<32x128xbf16>, vector<32x128xf32> -> vector<32x128xf32>
    %c31_i32 = arith.constant 31 : i32
    %13 = tpu.dynamic_rotate %8 by %c31_i32 dim 0 : vector<32x32xf32>, i32 -> vector<32x32xf32>
    %14 = arith.truncf %13 : vector<32x32xf32> to vector<32x32xbf16>
    %c1 = arith.constant 1 : index
    %c0_7 = arith.constant 0 : index
    %c0_8 = arith.constant 0 : index
    %15 = vector.load %arg3[%c1, %c0_7, %c0_8] : memref<3x32x128xbf16, #tpu.memory_space<vmem>>, vector<1x32x128xbf16>
    %16 = vector.shape_cast %15 : vector<1x32x128xbf16> to vector<32x128xbf16>
    %cst_9 = arith.constant dense<0.000000e+00> : vector<32x128xf32>
    %17 = tpu.matmul %14, %16, %cst_9 {dimension_numbers = #tpu.dot_dimension_numbers<[1], [0], [0], [1], [0, 0, 1, 1], [], []>} : vector<32x32xbf16>, vector<32x128xbf16>, vector<32x128xf32> -> vector<32x128xf32>
    %18 = arith.addf %12, %17 : vector<32x128xf32>
    %c30_i32 = arith.constant 30 : i32
    %19 = tpu.dynamic_rotate %8 by %c30_i32 dim 0 : vector<32x32xf32>, i32 -> vector<32x32xf32>
    %20 = arith.truncf %19 : vector<32x32xf32> to vector<32x32xbf16>
    %c2 = arith.constant 2 : index
    %c0_10 = arith.constant 0 : index
    %c0_11 = arith.constant 0 : index
    %21 = vector.load %arg3[%c2, %c0_10, %c0_11] : memref<3x32x128xbf16, #tpu.memory_space<vmem>>, vector<1x32x128xbf16>
    %22 = vector.shape_cast %21 : vector<1x32x128xbf16> to vector<32x128xbf16>
    %cst_12 = arith.constant dense<0.000000e+00> : vector<32x128xf32>
    %23 = tpu.matmul %20, %22, %cst_12 {dimension_numbers = #tpu.dot_dimension_numbers<[1], [0], [0], [1], [0, 0, 1, 1], [], []>} : vector<32x32xbf16>, vector<32x128xbf16>, vector<32x128xf32> -> vector<32x128xf32>
    %24 = arith.addf %18, %23 : vector<32x128xf32>
    %25 = vector.shape_cast %24 : vector<32x128xf32> to vector<2x16x128xf32>
    %c0_13 = arith.constant 0 : index
    %c0_14 = arith.constant 0 : index
    %26 = vector.load %arg5[%c0_13, %c0_14] : memref<16x128xf32, #tpu.memory_space<vmem>>, vector<16x128xf32>
    %27 = vector.shape_cast %26 : vector<16x128xf32> to vector<1x16x128xf32>
    %28 = vector.broadcast %27 : vector<1x16x128xf32> to vector<2x16x128xf32>
    %29 = arith.addf %25, %28 : vector<2x16x128xf32>
    %cst_15 = arith.constant dense<0xFF800000> : vector<2x128xf32>
    %30 = vector.multi_reduction <maximumf>, %29, %cst_15 [1] : vector<2x16x128xf32> to vector<2x128xf32>
    %c0_16 = arith.constant 0 : index
    %c0_17 = arith.constant 0 : index
    %31 = vector.load %arg4[%c0_16, %c0_17] : memref<1x128xf32, #tpu.memory_space<vmem>>, vector<1x128xf32>
    %32 = vector.broadcast %31 : vector<1x128xf32> to vector<2x128xf32>
    %33 = arith.addf %30, %32 : vector<2x128xf32>
    %cst_18 = arith.constant 0.000000e+00 : f32
    %34 = vector.broadcast %cst_18 : f32 to vector<2x128xf32>
    %35 = arith.maximumf %33, %34 : vector<2x128xf32>
    %36 = arith.truncf %35 : vector<2x128xf32> to vector<2x128xbf16>
    %c0_19 = arith.constant 0 : index
    %c0_20 = arith.constant 0 : index
    %37 = vector.load %arg6[%c0_19, %c0_20] : memref<128x512xbf16, #tpu.memory_space<vmem>>, vector<128x512xbf16>
    %cst_21 = arith.constant dense<0.000000e+00> : vector<2x512xf32>
    %38 = tpu.matmul %36, %37, %cst_21 {dimension_numbers = #tpu.dot_dimension_numbers<[1], [0], [0], [1], [0, 0, 1, 1], [], []>} : vector<2x128xbf16>, vector<128x512xbf16>, vector<2x512xf32> -> vector<2x512xf32>
    %c0_22 = arith.constant 0 : index
    %c0_23 = arith.constant 0 : index
    %39 = vector.load %arg7[%c0_22, %c0_23] : memref<1x512xf32, #tpu.memory_space<vmem>>, vector<1x512xf32>
    %40 = vector.broadcast %39 : vector<1x512xf32> to vector<2x512xf32>
    %41 = arith.addf %38, %40 : vector<2x512xf32>
    %cst_24 = arith.constant 0.000000e+00 : f32
    %42 = vector.broadcast %cst_24 : f32 to vector<2x512xf32>
    %43 = arith.maximumf %41, %42 : vector<2x512xf32>
    %44 = arith.truncf %43 : vector<2x512xf32> to vector<2x512xbf16>
    %c0_25 = arith.constant 0 : index
    %c0_26 = arith.constant 0 : index
    %45 = vector.load %arg8[%c0_25, %c0_26] : memref<512x128xbf16, #tpu.memory_space<vmem>>, vector<512x128xbf16>
    %cst_27 = arith.constant dense<0.000000e+00> : vector<2x128xf32>
    %46 = tpu.matmul %44, %45, %cst_27 {dimension_numbers = #tpu.dot_dimension_numbers<[1], [0], [0], [1], [0, 0, 1, 1], [], []>} : vector<2x512xbf16>, vector<512x128xbf16>, vector<2x128xf32> -> vector<2x128xf32>
    %c0_28 = arith.constant 0 : index
    %c0_29 = arith.constant 0 : index
    %47 = vector.load %arg9[%c0_28, %c0_29] : memref<1x128xf32, #tpu.memory_space<vmem>>, vector<1x128xf32>
    %48 = vector.broadcast %47 : vector<1x128xf32> to vector<2x128xf32>
    %49 = arith.addf %46, %48 : vector<2x128xf32>
    %c0_30 = arith.constant 0 : index
    %c0_31 = arith.constant 0 : index
    %50 = vector.load %arg10[%c0_30, %c0_31] : memref<2x128xf32, #tpu.memory_space<vmem>>, vector<2x128xf32>
    tpu.vector_store %arg10[%c0_30, %c0_31], %49 {strides = array<i32>} : memref<2x128xf32, #tpu.memory_space<vmem>>, vector<2x128xf32>,
    return
  }
  func.func @transform_0(%arg0: i32) -> (i32, i32) {
    %c0_i32 = arith.constant 0 : i32
    %c0_i32_0 = arith.constant 0 : i32
    return %arg0, %c0_i32 : i32, i32
  }
  func.func @transform_1(%arg0: i32) -> (i32, i32) {
    %c0_i32 = arith.constant 0 : i32
    %c0_i32_0 = arith.constant 0 : i32
    %c0_i32_1 = arith.constant 0 : i32
    return %c0_i32, %c0_i32_0 : i32, i32
  }
  func.func @transform_2(%arg0: i32) -> (i32, i32, i32) {
    %c0_i32 = arith.constant 0 : i32
    %c0_i32_0 = arith.constant 0 : i32
    %c0_i32_1 = arith.constant 0 : i32
    %c0_i32_2 = arith.constant 0 : i32
    return %c0_i32, %c0_i32_0, %c0_i32_1 : i32, i32, i32
  }
  func.func @transform_3(%arg0: i32) -> (i32, i32) {
    %c0_i32 = arith.constant 0 : i32
    %c0_i32_0 = arith.constant 0 : i32
    %c0_i32_1 = arith.constant 0 : i32
    return %c0_i32, %c0_i32_0 : i32, i32
  }
  func.func @transform_4(%arg0: i32) -> (i32, i32) {
    %c0_i32 = arith.constant 0 : i32
    %c0_i32_0 = arith.constant 0 : i32
    %c0_i32_1 = arith.constant 0 : i32
    return %c0_i32, %c0_i32_0 : i32, i32
  }
  func.func @transform_5(%arg0: i32) -> (i32, i32) {
    %c0_i32 = arith.constant 0 : i32
    %c0_i32_0 = arith.constant 0 : i32
    %c0_i32_1 = arith.constant 0 : i32
    return %c0_i32, %c0_i32_0 : i32, i32
  }
  func.func @transform_6(%arg0: i32) -> (i32, i32) {
    %c0_i32 = arith.constant 0 : i32
    %c0_i32_0 = arith.constant 0 : i32
    %c0_i32_1 = arith.constant 0 : i32
    return %c0_i32, %c0_i32_0 : i32, i32
  }
  func.func @transform_7(%arg0: i32) -> (i32, i32) {
    %c0_i32 = arith.constant 0 : i32
    %c0_i32_0 = arith.constant 0 : i32
    %c0_i32_1 = arith.constant 0 : i32
    return %c0_i32, %c0_i32_0 : i32, i32
  }
  func.func @transform_8(%arg0: i32) -> (i32, i32) {
    %c0_i32 = arith.constant 0 : i32
    %c0_i32_0 = arith.constant 0 : i32
    %c0_i32_1 = arith.constant 0 : i32
    return %c0_i32, %c0_i32_0 : i32, i32
  }
  func.func @transform_9(%arg0: i32) -> (i32, i32) {
    %c0_i32 = arith.constant 0 : i32
    %c0_i32_0 = arith.constant 0 : i32
    return %arg0, %c0_i32 : i32, i32
  }
}

</mosaic_0001>

<bundles_post_ra>
// kernel: textcnn_forward.1
= control target key start
LH: loop header
LB: loop body
LE: loop exit
PB: predicated region body
PF: predicated region fallthrough
CT: control target
= control target key end

     0   :  { %14 = vsyncpa [#allocation3], 0  ;;  %s1567_s0 = inlined_call_operand.vmem [shape: s32[32,1], index: 0, kind: input, shape index: {}]   ;;  %s1568_s1 = inlined_call_operand.vmem [shape: bf16[56,32], index: 1, kind: input, shape index: {}]   ;;  %s1569_s2 = inlined_call_operand.vmem [shape: bf16[3,32,128], index: 2, kind: input, shape index: {}]   ;;  %s1570_s3 = inlined_call_operand.vmem [shape: f32[1,128], index: 3, kind: input, shape index: {}]   ;;  %s1571_s4 = inlined_call_operand.vmem [shape: f32[16,128], index: 4, kind: input, shape index: {}]   ;;  %s1572_s5 = inlined_call_operand.hbm [shape: bf16[128,512], index: 5, kind: input, shape index: {}]   ;;  %s1573_s6 = inlined_call_operand.vmem [shape: f32[1,512], index: 6, kind: input, shape index: {}]   ;;  %s1574_s7 = inlined_call_operand.hbm [shape: bf16[512,128], index: 7, kind: input, shape index: {}]   ;;  %s1575_s8 = inlined_call_operand.vmem [shape: f32[1,128], index: 8, kind: input, shape index: {}]   ;;  %s1576_s9 = inlined_call_operand.hbm [shape: f32[2,128], index: 9, kind: output, shape index: {}]  }
   0x1   :  { %15 = vsyncpa [#allocation6], 0 }
   0x2   :  { %16 = vsyncpa [#allocation4], 0  ;;  %s31_s11 = sshll.u32 %s1572_s5, 4  ;;  %s1420_s12 = smov [#allocation2]   ;;  %s32_s11 = int_to_ptr.hbm [resolvable:$true] %s31_s11 }
   0x3   :  { %s33_s13 = sshll.u32 %s1420_s12, 4  ;;  %s46_s16 = sshll.u32 %s1574_s7, 4  ;;  %s34_s13 = int_to_ptr.vmem [resolvable:$true] %s33_s13  ;;  %s47_s16 = int_to_ptr.hbm [resolvable:$true] %s46_s16 }
   0x4   :  { %s1421_s17 = smov 256   ;;  %s1422_s18 = smov 16  }
   0x5   :  { %39 = dma.hbm_to_vmem [thread:$0]  %s32_s11, 4096, %s34_s13, [#allocation3], %s1421_s17, %s1421_s17, %s1422_s18  }
   0x6   :  { %s1423_s19 = smov [#allocation5]   ;;  %s1424_s21 = smov 64  }
   0x7   :  { %s48_s20 = sshll.u32 %s1423_s19, 4  ;;  %s1425_s22 = smov 4   ;;  %s49_s20 = int_to_ptr.vmem [resolvable:$true] %s48_s20 }
   0x8   :  { %54 = dma.hbm_to_vmem [thread:$0]  %s47_s16, 4096, %s49_s20, [#allocation6], %s1424_s21, %s1424_s21, %s1425_s22  }
   0x9   :  { %1414 = dma.done.wait [#allocation3], 4096  }
   0xa   :  { %1415 = vsyncadd [#allocation3], 4294963200 }
   0xb   :  { %1416 = dma.done.wait [#allocation6], 4096  }
   0xc   :  { %1417 = vsyncadd [#allocation6], 4294963200  ;;  %v1426_v0 = vmov 0   ;;  %v66_v1 = vld [vmem:[%s1567_s0] sm:$0xff]  ;;  %v68_v2 = vld [vmem:[%s1567_s0 + $0x10] sm:$0xff]  ;;  %vm133_vm0 = vcmask 1043456   ;;  %v70_v12 = vlaneseq }
   0xd   :  { %1338 = vset.pattern.permute.xlu0 %v1426_v0  ;;  %1339 = vset.pattern.permute.xlu1 %v1426_v0  ;;  %v104_v3 = vld [vmem:[%s1568_s1 + $0x18] sm:$0xf]  ;;  %v67_v6 = vld [vmem:[%s1567_s0 + $0x8] sm:$0xff]  ;;  %v1258_v9 = vld [vmem:[%s1568_s1 + $0x10] sm:$0xff]  ;;  %v1427_v17 = vmov 0.0   ;;  %vm126_vm3 = vcmask 457728  }
   0xe   :  { %73 = vperm.xlu0 %1338, %v66_v1   ;;  %79 = vperm.xlu1 %1339, %v68_v2   ;;  %v118_v4 = vunpack.c.l.b16 %v104_v3  ;;  %v69_v7 = vld [vmem:[%s1567_s0 + $0x18] sm:$0xff]  ;;  %v1257_v10 = vld [vmem:[%s1568_s1 + $0x8] sm:$0xff]  ;;  %v1256_v11 = vld [vmem:[%s1568_s1] sm:$0xff]  ;;  %v71_v14 = vand.u32 127, %v70_v12  ;;  %vm192_vm6 = vcmask 261120   ;;  %v167_v34 = vshrl.u32 %v70_v12, 7 }
   0xf   :  { %v1260_v25 = vld [vmem:[%s1569_s2 + $0x8] sm:$0xff]  ;;  %v1259_v26 = vld [vmem:[%s1569_s2] sm:$0xff]  ;;  %v1262_v27 = vld [vmem:[%s1569_s2 + $0x18] sm:$0xff]  ;;  %vm389_vm9 = vcmask 1041409   ;;  %s1428_s30 = smov [#allocation7]   ;;  %s933_s13 = sshll.u32 %s1576_s9, 4  ;;  %s934_s13 = int_to_ptr.hbm [resolvable:$true] %s933_s13 }
  0x10   :  { %v122_v5 = vpack.c.b16 %v118_v4, %v118_v4  ;;  %242 = vmatpush.bf16.msra.mxu2 %v1260_v25  ;;  %v1264_v28 = vld [vmem:[%s1569_s2 + $0x28] sm:$0xff]  ;;  %205 = vmatpush.bf16.msra.mxu1 %v1262_v27  ;;  %v1261_v29 = vld [vmem:[%s1569_s2 + $0x10] sm:$0xff]  ;;  %v1263_v30 = vld [vmem:[%s1569_s2 + $0x20] sm:$0xff]  ;;  %vm168_vm7 = vcmp.lt.s32.totalorder %v167_v34, 7  ;;  %vm259_vm8 = vcmp.lt.s32.totalorder %v167_v34, 6  ;;  %s931_s10 = sshll.u32 %s1428_s30, 4  ;;  %s932_s10 = int_to_ptr.vmem [resolvable:$true] %s931_s10 }
  0x11   :  { %295 = vmatpush.bf16.msra.mxu3 %v1264_v28  ;;  %v1293_v58 = vld [vmem:[#allocation2 + $0xe4] sm:$0xf]  ;;  %v1116_v59 = vld [vmem:[#allocation2 + $0xf0] sm:$0xf0]  ;;  %v1122_v60 = vld [vmem:[#allocation2 + $0xe8] sm:$0xf] }
  0x12   :  { %v135_v8 = vsel %vm133_vm0, %v122_v5, 0  ;;  %v1119_v61 = vor.u32 %v1293_v58, %v1116_v59  ;;  %v1296_v62 = vld [vmem:[#allocation2 + $0xf4] sm:$0xf0]  ;;  %v1114_v63 = vld [vmem:[#allocation2 + $0xe0] sm:$0xf]  ;;  %v1549_v59 = vld [vmem:[%s1571_s4 + $0x8] sm:$0xff] }
  0x13   :  { %141 = vmatpush.bf16.msra.mxu0 %v135_v8  ;;  %v1295_v0 = vld [vmem:[#allocation2 + $0xec] sm:$0xf0]  ;;  %v1123_v2 = vor.u32 %v1296_v62, %v1122_v60  ;;  %v1294_v4 = vld [vmem:[#allocation2 + $0xec] sm:$0xf]  ;;  %v1124_v5 = vld [vmem:[#allocation2 + $0xf8] sm:$0xf0] }
  0x14   :  { %243 = vmatpush.bf16.msra.mxu2 %v1259_v26  ;;  %206 = vmatpush.bf16.msra.mxu1 %v1261_v29  ;;  %v1115_v3 = vor.u32 %v1295_v0, %v1114_v63  ;;  %v1289_v8 = vld [vmem:[#allocation2 + $0xc4] sm:$0xf]  ;;  %v1292_v12 = vld [vmem:[#allocation2 + $0xd4] sm:$0xf0]  ;;  %v1082_v25 = vld [vmem:[#allocation2 + $0xa0] sm:$0xf] }
  0x15   :  { %296 = vmatpush.bf16.msra.mxu3 %v1263_v30  ;;  %v1287_v26 = vld [vmem:[#allocation2 + $0xac] sm:$0xf0]  ;;  %v1286_v30 = vld [vmem:[#allocation2 + $0xac] sm:$0xf]  ;;  %v1060_v63 = vld [vmem:[#allocation2 + $0x78] sm:$0xf0] }
  0x16   :  { %76 = vperm.xlu0 %1338, %v67_v6   ;;  %82 = vperm.xlu1 %1339, %v69_v7   ;;  %v1127_v6 = vor.u32 %v1294_v4, %v1124_v5  ;;  %v1083_v29 = vor.u32 %v1287_v26, %v1082_v25  ;;  %v1278_v62 = vld [vmem:[#allocation2 + $0x6c] sm:$0xf]  ;;  %v1036_v4 = vld [vmem:[#allocation2 + $0x50] sm:$0xf0]  ;;  %v1042_v5 = vld [vmem:[#allocation2 + $0x48] sm:$0xf] }
  0x17   :  { %142 = vmatpush.bf16.msra.mxu0 %v1258_v9  ;;  %v1100_v9 = vld [vmem:[#allocation2 + $0xd0] sm:$0xf0]  ;;  %v1271_v25 = vld [vmem:[#allocation2 + $0x2c] sm:$0xf0] }
  0x18   :  { %566 = vmatpush.bf16.msrb.mxu2 %v1119_v61  ;;  %553 = vmatpush.bf16.msrb.mxu1 %v1115_v3  ;;  %v1273_v3 = vld [vmem:[#allocation2 + $0x44] sm:$0xf] }
  0x19   :  { %579 = vmatpush.bf16.msrb.mxu3 %v1123_v2 }
  0x1b   :  { %143 = vmatpush.bf16.msra.mxu0 %v1257_v10  ;;  %v1106_v10 = vld [vmem:[#allocation2 + $0xc8] sm:$0xf] }
  0x1f   :  { %144 = vmatpush.bf16.msra.mxu0 %v1256_v11  ;;  %v1103_v11 = vor.u32 %v1289_v8, %v1100_v9  ;;  %v1039_v8 = vor.u32 %v1273_v3, %v1036_v4  ;;  %v1276_v9 = vld [vmem:[#allocation2 + $0x54] sm:$0xf0] }
  0x21   :  { %567 = vmatpush.bf16.msrb.mxu2 %v1103_v11  ;;  %v1275_v11 = vld [vmem:[#allocation2 + $0x4c] sm:$0xf0] }
  0x23   :  { %592 = vmatpush.bf16.msrb.mxu0 %v1127_v6 }
  0x80   :  { %v74_v13 = vpop.permute.xlu0 %73  ;;  %v80_v15 = vpop.permute.xlu1 %79 }
  0x81   :  { %vm84_vm1 = vcmp.eq.s32.totalorder %v71_v14, %v74_v13  ;;  %vm86_vm4 = vcmp.eq.s32.totalorder %v71_v14, %v80_v15  ;;  %v1098_v13 = vld [vmem:[#allocation2 + $0xc0] sm:$0xf]  ;;  %v1107_v15 = vor.u32 %v1292_v12, %v1106_v10 }
  0x82   :  { %v944_v18 = vsel %vm84_vm1, 1.0, %v1427_v17  ;;  %v946_v22 = vsel %vm86_vm4, 1.0, %v1427_v17  ;;  %v1034_v10 = vld [vmem:[#allocation2 + $0x40] sm:$0xf] }
  0x83   :  { %580 = vmatpush.bf16.msrb.mxu3 %v1107_v15  ;;  %v1274_v15 = vld [vmem:[#allocation2 + $0x4c] sm:$0xf] }
  0x88   :  { %v77_v16 = vpop.permute.xlu0 %76  ;;  %v83_v21 = vpop.permute.xlu1 %82 }
  0x89   :  { %vm85_vm2 = vcmp.eq.s32.totalorder %v71_v14, %v77_v16  ;;  %vm87_vm5 = vcmp.eq.s32.totalorder %v71_v14, %v83_v21  ;;  %v1291_v14 = vld [vmem:[#allocation2 + $0xcc] sm:$0xf0]  ;;  %v1084_v21 = vld [vmem:[#allocation2 + $0xb0] sm:$0xf0] }
  0x8a   :  { %v945_v19 = vsel %vm85_vm2, 1.0, %v1427_v17  ;;  %v947_v23 = vsel %vm87_vm5, 1.0, %v1427_v17  ;;  %v1099_v16 = vor.u32 %v1291_v14, %v1098_v13  ;;  %v1290_v17 = vld [vmem:[#allocation2 + $0xcc] sm:$0xf]  ;;  %v1043_v13 = vor.u32 %v1276_v9, %v1042_v5 }
  0x8b   :  { %v96_v20 = vpack.c.bf16 %v945_v19, %v944_v18  ;;  %v97_v24 = vpack.c.bf16 %v947_v23, %v946_v22  ;;  %v1108_v18 = vld [vmem:[#allocation2 + $0xd8] sm:$0xf0]  ;;  %v1090_v22 = vld [vmem:[#allocation2 + $0xa8] sm:$0xf]  ;;  %v1035_v14 = vor.u32 %v1275_v11, %v1034_v10  ;;  %v1340_v10 = vld [vmem:[%s1570_s3] ss:$0 sm:$0xff] }
  0x8c   :  { %v1111_v19 = vor.u32 %v1290_v17, %v1108_v18  ;;  %554 = vmatpush.bf16.msrb.mxu1 %v1099_v16  ;;  %v1044_v16 = vld [vmem:[#allocation2 + $0x58] sm:$0xf0] }
  0x8d   :  { %960 = vmatmul.msk.bf16.vlgmr.msra.gmra.mxu0 %vm126_vm3, %v96_v20  ;;  %v1285_v20 = vld [vmem:[#allocation2 + $0xa4] sm:$0xf]  ;;  %v1047_v18 = vor.u32 %v1274_v15, %v1044_v16 }
  0x8e   :  { %593 = vmatpush.bf16.msrb.mxu0 %v1111_v19  ;;  %v1087_v23 = vor.u32 %v1285_v20, %v1084_v21  ;;  %v1269_v19 = vld [vmem:[#allocation2 + $0x24] sm:$0xf]  ;;  %v1020_v20 = vld [vmem:[#allocation2 + $0x30] sm:$0xf0]  ;;  %v1026_v21 = vld [vmem:[#allocation2 + $0x28] sm:$0xf] }
  0x8f   :  { %v1317_v15 = vld [vmem:[#allocation5 + $0xa0] sm:$0xff] }
  0x90   :  { %568 = vmatpush.bf16.msrb.mxu2 %v1087_v23  ;;  %555 = vmatpush.bf16.msrb.mxu1 %v1083_v29  ;;  %v1272_v23 = vld [vmem:[#allocation2 + $0x34] sm:$0xf0]  ;;  %v1270_v29 = vld [vmem:[#allocation2 + $0x2c] sm:$0xf] }
  0x9d   :  { %961 = vmatmul.msk.bf16.gmra.mxu0 %vm126_vm3, %v97_v24  ;;  %v1288_v24 = vld [vmem:[#allocation2 + $0xb4] sm:$0xf0] }
  0x9e   :  { %v1091_v28 = vor.u32 %v1288_v24, %v1090_v22  ;;  %v1023_v22 = vor.u32 %v1269_v19, %v1020_v20  ;;  %v1018_v24 = vld [vmem:[#allocation2 + $0x20] sm:$0xf]  ;;  %v1300_v19 = vld [vmem:[#allocation5 + $0x18] sm:$0xff] }
  0x9f   :  { %v1324_v20 = vld [vmem:[#allocation5 + $0xd8] sm:$0xff] }
  0xa0   :  { %581 = vmatpush.bf16.msrb.mxu3 %v1091_v28  ;;  %v1019_v28 = vor.u32 %v1271_v25, %v1018_v24 }
 0x10a   :  { %v146_v31 = vpop.f32.mrf.mxu0 }
 0x10b   :  { %v162_v38 = vrot.slane %v146_v31, 1  ;;  %v255_v39 = vrot.slane %v146_v31, 2 }
 0x112   :  { %v148_v32 = vpop.f32.mrf.mxu0 }
 0x113   :  { %v156_v33 = vpack.c.bf16 %v148_v32, %v146_v31  ;;  %v163_v35 = vrot.slane %v148_v32, 1  ;;  %v256_v36 = vrot.slane %v148_v32, 2  ;;  %v1092_v31 = vld [vmem:[#allocation2 + $0xb8] sm:$0xf0] }
 0x114   :  { %v1095_v32 = vor.u32 %v1286_v30, %v1092_v31  ;;  %v1028_v30 = vld [vmem:[#allocation2 + $0x38] sm:$0xf0] }
 0x115   :  { %984 = vmatmul.msk.bf16.vlgmr.msra.gmra.mxu2 %vm192_vm6, %v156_v33  ;;  %v171_v43 = vsel %vm168_vm7, %v162_v38, %v163_v35  ;;  %v262_v45 = vsel %vm259_vm8, %v255_v39, %v256_v36 }
 0x116   :  { %594 = vmatpush.bf16.msrb.mxu0 %v1095_v32  ;;  %v1031_v32 = vor.u32 %v1270_v29, %v1028_v30 }
 0x11a   :  { %v151_v37 = vpop.f32.mrf.mxu0 }
 0x11b   :  { %v164_v40 = vrot.slane %v151_v37, 1  ;;  %v257_v41 = vrot.slane %v151_v37, 2 }
 0x11d   :  { %v170_v42 = vsel %vm168_vm7, %v163_v35, %v164_v40  ;;  %v261_v44 = vsel %vm259_vm8, %v256_v36, %v257_v41  ;;  %v1281_v35 = vld [vmem:[#allocation2 + $0x84] sm:$0xf]  ;;  %v1068_v36 = vld [vmem:[#allocation2 + $0x90] sm:$0xf0] }
 0x11e   :  { %v173_v46 = vpack.c.bf16 %v170_v42, %v171_v43  ;;  %v264_v47 = vpack.c.bf16 %v261_v44, %v262_v45  ;;  %v1282_v44 = vld [vmem:[#allocation2 + $0x8c] sm:$0xf]  ;;  %v1076_v45 = vld [vmem:[#allocation2 + $0x98] sm:$0xf0] }
 0x120   :  { %974 = vmatmul.msk.bf16.vlgmr.msra.gmra.mxu1 %vm192_vm6, %v173_v46  ;;  %998 = vmatmul.msk.bf16.vlgmr.msra.gmra.mxu3 %vm192_vm6, %v264_v47  ;;  %v1079_v47 = vor.u32 %v1282_v44, %v1076_v45 }
 0x122   :  { %v153_v48 = vpop.f32.mrf.mxu0  ;;  %595 = vmatpush.bf16.msrb.mxu0 %v1079_v47 }
 0x123   :  { %v157_v49 = vpack.c.bf16 %v153_v48, %v151_v37  ;;  %v165_v50 = vrot.slane %v153_v48, 1  ;;  %v258_v51 = vrot.slane %v153_v48, 2  ;;  %v1074_v37 = vld [vmem:[#allocation2 + $0x88] sm:$0xf]  ;;  %v1544_v48 = vld [vmem:[%s1571_s4] sm:$0xff] }
 0x125   :  { %985 = vmatmul.msk.bf16.gmra.mxu2 %vm192_vm6, %v157_v49  ;;  %v169_v52 = vsel %vm168_vm7, %v164_v40, %v165_v50  ;;  %v172_v53 = vsel %vm168_vm7, %v165_v50, %v162_v38  ;;  %v260_v54 = vsel %vm259_vm8, %v257_v41, %v258_v51  ;;  %v263_v55 = vsel %vm259_vm8, %v258_v51, %v255_v39  ;;  %v1284_v39 = vld [vmem:[#allocation2 + $0x94] sm:$0xf0]  ;;  %v1066_v40 = vld [vmem:[#allocation2 + $0x80] sm:$0xf]  ;;  %v1283_v41 = vld [vmem:[#allocation2 + $0x8c] sm:$0xf0] }
 0x126   :  { %v174_v56 = vpack.c.bf16 %v172_v53, %v169_v52  ;;  %v265_v57 = vpack.c.bf16 %v263_v55, %v260_v54  ;;  %v1071_v38 = vor.u32 %v1281_v35, %v1068_v36  ;;  %v1075_v42 = vor.u32 %v1284_v39, %v1074_v37  ;;  %v1277_v49 = vld [vmem:[#allocation2 + $0x64] sm:$0xf]  ;;  %v1052_v50 = vld [vmem:[#allocation2 + $0x70] sm:$0xf0]  ;;  %v1058_v51 = vld [vmem:[#allocation2 + $0x68] sm:$0xf] }
 0x127   :  { %v1067_v43 = vor.u32 %v1283_v41, %v1066_v40  ;;  %v1055_v54 = vor.u32 %v1277_v49, %v1052_v50  ;;  %v1280_v55 = vld [vmem:[#allocation2 + $0x74] sm:$0xf0]  ;;  %v1010_v35 = vld [vmem:[#allocation2 + $0x8] sm:$0xf]  ;;  %v1267_v39 = vld [vmem:[#allocation2 + $0xc] sm:$0xf0] }
 0x128   :  { %569 = vmatpush.bf16.msrb.mxu2 %v1071_v38  ;;  %582 = vmatpush.bf16.msrb.mxu3 %v1075_v42  ;;  %v1059_v60 = vor.u32 %v1280_v55, %v1058_v51  ;;  %v1268_v37 = vld [vmem:[#allocation2 + $0x14] sm:$0xf0]  ;;  %v1002_v38 = vld [vmem:[#allocation2] sm:$0xf]  ;;  %v1266_v42 = vld [vmem:[#allocation2 + $0xc] sm:$0xf] }
 0x129   :  { %556 = vmatpush.bf16.msrb.mxu1 %v1067_v43  ;;  %v1011_v40 = vor.u32 %v1268_v37, %v1010_v35  ;;  %v1003_v41 = vor.u32 %v1267_v39, %v1002_v38  ;;  %v1012_v43 = vld [vmem:[#allocation2 + $0x18] sm:$0xf0]  ;;  %v1322_v37 = vld [vmem:[#allocation5 + $0xc8] sm:$0xff]  ;;  %v1307_v38 = vld [vmem:[#allocation5 + $0x50] sm:$0xff] }
 0x12a   :  { %v1015_v45 = vor.u32 %v1266_v42, %v1012_v43  ;;  %v1304_v55 = vld [vmem:[#allocation5 + $0x38] sm:$0xff]  ;;  %v1315_v39 = vld [vmem:[#allocation5 + $0x90] sm:$0xff]  ;;  %v1306_v42 = vld [vmem:[#allocation5 + $0x48] sm:$0xff] }
 0x12b   :  { %v1314_v43 = vld [vmem:[#allocation5 + $0x88] sm:$0xff] }
 0x12c   :  { %570 = vmatpush.bf16.msrb.mxu2 %v1055_v54  ;;  %583 = vmatpush.bf16.msrb.mxu3 %v1059_v60 }
 0x130   :  { %975 = vmatmul.msk.bf16.gmra.mxu1 %vm192_vm6, %v174_v56  ;;  %999 = vmatmul.msk.bf16.gmra.mxu3 %vm192_vm6, %v265_v57  ;;  %v1050_v56 = vld [vmem:[#allocation2 + $0x60] sm:$0xf]  ;;  %v1279_v57 = vld [vmem:[#allocation2 + $0x6c] sm:$0xf0] }
 0x131   :  { %v1051_v61 = vor.u32 %v1279_v57, %v1050_v56  ;;  %571 = vmatpush.bf16.msrb.mxu2 %v1039_v8  ;;  %584 = vmatpush.bf16.msrb.mxu3 %v1043_v13  ;;  %v1328_v56 = vld [vmem:[#allocation5 + $0xf8] sm:$0xff]  ;;  %v1318_v8 = vld [vmem:[#allocation5 + $0xa8] sm:$0xff]  ;;  %v1325_v13 = vld [vmem:[#allocation5 + $0xe0] sm:$0xff] }
 0x132   :  { %v1312_v57 = vld [vmem:[#allocation5 + $0x78] sm:$0xff] }
 0x133   :  { %557 = vmatpush.bf16.msrb.mxu1 %v1051_v61 }
 0x135   :  { %572 = vmatpush.bf16.msrb.mxu2 %v1023_v22  ;;  %v1316_v22 = vld [vmem:[#allocation5 + $0x98] sm:$0xff] }
 0x137   :  { %558 = vmatpush.bf16.msrb.mxu1 %v1035_v14  ;;  %v1309_v14 = vld [vmem:[#allocation5 + $0x60] sm:$0xff] }
 0x13b   :  { %559 = vmatpush.bf16.msrb.mxu1 %v1019_v28 }
 0x13f   :  { %560 = vmatpush.bf16.msrb.mxu1 %v1003_v41  ;;  %v1321_v41 = vld [vmem:[#allocation5 + $0xc0] sm:$0xff] }
 0x143   :  { %873 = vmatpush.bf16.msra.mxu1 %v1304_v55 }
 0x198   :  { %v245_v1 = vpop.f32.mrf.mxu2 }
 0x19d   :  { %v208_v7 = vpop.f32.mrf.mxu1 }
 0x19e   :  { %v246_v46 = vadd.f32 %v245_v1, %v208_v7  ;;  %v1063_v1 = vor.u32 %v1278_v62, %v1060_v63  ;;  %v1303_v63 = vld [vmem:[#allocation5 + $0x30] sm:$0xff] }
 0x19f   :  { %874 = vmatpush.bf16.msra.mxu1 %v1303_v63 }
 0x1a0   :  { %v247_v33 = vpop.f32.mrf.mxu2  ;;  %596 = vmatpush.bf16.msrb.mxu0 %v1063_v1  ;;  %v1311_v1 = vld [vmem:[#allocation5 + $0x70] sm:$0xff] }
 0x1a3   :  { %v298_v27 = vpop.f32.mrf.mxu3 }
 0x1a4   :  { %v308_v52 = vadd.f32 %v298_v27, %v246_v46  ;;  %597 = vmatpush.bf16.msrb.mxu0 %v1047_v18  ;;  %v1027_v27 = vor.u32 %v1272_v23, %v1026_v21  ;;  %v1308_v21 = vld [vmem:[#allocation5 + $0x58] sm:$0xff] }
 0x1a5   :  { %v210_v34 = vpop.f32.mrf.mxu1 }
 0x1a6   :  { %v248_v53 = vadd.f32 %v247_v33, %v210_v34  ;;  %v314_v6 = vadd.f32 %v1544_v48, %v308_v52  ;;  %v1265_v33 = vld [vmem:[#allocation2 + $0x4] sm:$0xf]  ;;  %v1004_v34 = vld [vmem:[#allocation2 + $0x10] sm:$0xf0]  ;;  %585 = vmatpush.bf16.msrb.mxu3 %v1027_v27 }
 0x1a7   :  { %v1007_v36 = vor.u32 %v1265_v33, %v1004_v34  ;;  %v1323_v27 = vld [vmem:[#allocation5 + $0xd0] sm:$0xff] }
 0x1a8   :  { %v250_v12 = vpop.f32.mrf.mxu2  ;;  %598 = vmatpush.bf16.msrb.mxu0 %v1031_v32 }
 0x1a9   :  { %573 = vmatpush.bf16.msrb.mxu2 %v1007_v36  ;;  %v1298_v36 = vld [vmem:[#allocation5 + $0x8] sm:$0xff] }
 0x1aa   :  { %586 = vmatpush.bf16.msrb.mxu3 %v1011_v40  ;;  %v1297_v40 = vld [vmem:[#allocation5] sm:$0xff] }
 0x1ab   :  { %v300_v58 = vpop.f32.mrf.mxu3 }
 0x1ac   :  { %v309_v0 = vadd.f32 %v300_v58, %v248_v53  ;;  %599 = vmatpush.bf16.msrb.mxu0 %v1015_v45  ;;  %v1320_v58 = vld [vmem:[#allocation5 + $0xb8] sm:$0xff]  ;;  %v1313_v45 = vld [vmem:[#allocation5 + $0x80] sm:$0xff] }
 0x1ad   :  { %v213_v2 = vpop.f32.mrf.mxu1  ;;  %886 = vmatpush.bf16.msra.mxu2 %v1312_v57 }
 0x1ae   :  { %v315_v7 = vadd.f32 %v1549_v59, %v309_v0  ;;  %v251_v47 = vadd.f32 %v250_v12, %v213_v2  ;;  %v1327_v0 = vld [vmem:[#allocation5 + $0xf0] sm:$0xff]  ;;  %899 = vmatpush.bf16.msra.mxu3 %v1320_v58  ;;  %v1301_v12 = vld [vmem:[#allocation5 + $0x20] sm:$0xff] }
 0x1af   :  { %v1319_v2 = vld [vmem:[#allocation5 + $0xb0] sm:$0xff] }
 0x1b0   :  { %v318_v17 = vmax.f32 %v314_v6, %v315_v7  ;;  %v252_v49 = vpop.f32.mrf.mxu2  ;;  %912 = vmatpush.bf16.msra.mxu0 %v1328_v56  ;;  %v1302_v6 = vld [vmem:[#allocation5 + $0x28] sm:$0xff] }
 0x1b1   :  { %v1326_v7 = vld [vmem:[#allocation5 + $0xe8] sm:$0xff]  ;;  %887 = vmatpush.bf16.msra.mxu2 %v1311_v1  ;;  %875 = vmatpush.bf16.msra.mxu1 %v1302_v6 }
 0x1b2   :  { %v319_v26 = vrot.slane %v318_v17, 4  ;;  %900 = vmatpush.bf16.msra.mxu3 %v1319_v2 }
 0x1b3   :  { %v303_v31 = vpop.f32.mrf.mxu3 }
 0x1b4   :  { %v320_v44 = vmax.f32 %v318_v17, %v319_v26  ;;  %v310_v51 = vadd.f32 %v303_v31, %v251_v47  ;;  %913 = vmatpush.bf16.msra.mxu0 %v1327_v0  ;;  %v1299_v26 = vld [vmem:[#allocation5 + $0x10] sm:$0xff] }
 0x1b5   :  { %v215_v46 = vpop.f32.mrf.mxu1  ;;  %876 = vmatpush.bf16.msra.mxu1 %v1301_v12 }
 0x1b6   :  { %v321_v50 = vrot.slane %v320_v44, 2  ;;  %v253_v52 = vadd.f32 %v252_v49, %v215_v46  ;;  %v316_v61 = vadd.f32 %v1544_v48, %v310_v51  ;;  %v1310_v48 = vld [vmem:[#allocation5 + $0x68] sm:$0xff]  ;;  %901 = vmatpush.bf16.msra.mxu3 %v1318_v8  ;;  %v374_v46 = vld [vmem:[%s1573_s6] sm:$0xf] }
 0x1b7   :  { %888 = vmatpush.bf16.msra.mxu2 %v1310_v48  ;;  %v376_v47 = vperm.slane %v374_v46, 0  ;;  %v379_v49 = vperm.slane %v374_v46, 3  ;;  %v377_v55 = vperm.slane %v374_v46, 1  ;;  %v378_v57 = vperm.slane %v374_v46, 2 }
 0x1b8   :  { %v322_v60 = vmax.f32 %v320_v44, %v321_v50  ;;  %914 = vmatpush.bf16.msra.mxu0 %v1326_v7  ;;  %v1305_v44 = vld [vmem:[#allocation5 + $0x40] sm:$0xff] }
 0x1b9   :  { %877 = vmatpush.bf16.msra.mxu1 %v1300_v19 }
 0x1ba   :  { %v323_v4 = vrot.slane %v322_v60, 1  ;;  %902 = vmatpush.bf16.msra.mxu3 %v1317_v15 }
 0x1bb   :  { %v305_v53 = vpop.f32.mrf.mxu3  ;;  %889 = vmatpush.bf16.msra.mxu2 %v1309_v14 }
 0x1bc   :  { %v311_v54 = vadd.f32 %v305_v53, %v253_v52  ;;  %v324_v9 = vmax.f32 %v322_v60, %v323_v4  ;;  %915 = vmatpush.bf16.msra.mxu0 %v1325_v13 }
 0x1bd   :  { %878 = vmatpush.bf16.msra.mxu1 %v1299_v26 }
 0x1be   :  { %v317_v62 = vadd.f32 %v1549_v59, %v311_v54  ;;  %v336_v17 = vadd.f32 %v1340_v10, %v324_v9  ;;  %903 = vmatpush.bf16.msra.mxu3 %v1316_v22  ;;  %v1341_v9 = vld [vmem:[%s1575_s8] ss:$0 sm:$0xff] }
 0x1bf   :  { %890 = vmatpush.bf16.msra.mxu2 %v1308_v21 }
 0x1c0   :  { %v325_v3 = vmax.f32 %v316_v61, %v317_v62  ;;  %v338_v24 = vmax.f32 %v336_v17, 0.0  ;;  %916 = vmatpush.bf16.msra.mxu0 %v1324_v20 }
 0x1c1   :  { %879 = vmatpush.bf16.msra.mxu1 %v1298_v36 }
 0x1c2   :  { %v326_v5 = vrot.slane %v325_v3, 4  ;;  %v340_v29 = vpack.c.bf16 %v338_v24, %v338_v24  ;;  %904 = vmatpush.bf16.msra.mxu3 %v1315_v39 }
 0x1c3   :  { %891 = vmatpush.bf16.msra.mxu2 %v1307_v38 }
 0x1c4   :  { %v327_v59 = vmax.f32 %v325_v3, %v326_v5  ;;  %917 = vmatpush.bf16.msra.mxu0 %v1323_v27  ;;  %v386_v32 = vunpack.c.l.b16 %v340_v29 }
 0x1c5   :  { %880 = vmatpush.bf16.msra.mxu1 %v1297_v40 }
 0x1c6   :  { %v328_v11 = vrot.slane %v327_v59, 2  ;;  %905 = vmatpush.bf16.msra.mxu3 %v1314_v43 }
 0x1c7   :  { %892 = vmatpush.bf16.msra.mxu2 %v1306_v42 }
 0x1c8   :  { %v329_v16 = vmax.f32 %v327_v59, %v328_v11  ;;  %918 = vmatpush.bf16.msra.mxu0 %v1322_v37 }
 0x1ca   :  { %v330_v18 = vrot.slane %v329_v16, 1  ;;  %906 = vmatpush.bf16.msra.mxu3 %v1313_v45 }
 0x1cb   :  { %893 = vmatpush.bf16.msra.mxu2 %v1305_v44 }
 0x1cc   :  { %v331_v23 = vmax.f32 %v329_v16, %v330_v18  ;;  %919 = vmatpush.bf16.msra.mxu0 %v1321_v41 }
 0x1ce   :  { %v337_v25 = vadd.f32 %v1340_v10, %v331_v23 }
 0x1d0   :  { %v339_v28 = vmax.f32 %v337_v25, 0.0 }
 0x1d2   :  { %v341_v30 = vpack.c.bf16 %v339_v28, %v339_v28 }
 0x1d4   :  { %v387_v31 = vunpack.c.l.b16 %v341_v30 }
 0x1d6   :  { %v388_v33 = vrot.slane %v387_v31, 7 }
 0x1d8   :  { %v390_v34 = vsel %vm389_vm9, %v388_v33, %v386_v32 }
 0x1d9   :  { %v391_v35 = vpack.c.b16 %v390_v34, %v390_v34 }
 0x1db   :  { %561 = vmatmul.bf16.vlgmr.msrb.gmra.mxu1 %v391_v35  ;;  %574 = vmatmul.bf16.vlgmr.msrb.gmra.mxu2 %v391_v35 }
 0x1dc   :  { %587 = vmatmul.bf16.vlgmr.msrb.gmra.mxu3 %v391_v35  ;;  %600 = vmatmul.bf16.vlgmr.msrb.gmra.mxu0 %v391_v35 }
 0x258   :  { %v562_v50 = vpop.f32.mrf.mxu1 }
 0x259   :  { %v563_v51 = vadd.f32 %v562_v50, %v376_v47  ;;  %v601_v52 = vpop.f32.mrf.mxu0 }
 0x25a   :  { %v602_v53 = vadd.f32 %v601_v52, %v379_v49 }
 0x25b   :  { %v605_v54 = vmax.f32 %v563_v51, 0.0 }
 0x25c   :  { %v608_v56 = vmax.f32 %v602_v53, 0.0 }
 0x25d   :  { %v609_v58 = vpack.c.bf16 %v605_v54, %v605_v54 }
 0x25e   :  { %v612_v60 = vpack.c.bf16 %v608_v56, %v608_v56  ;;  %v575_v61 = vpop.f32.mrf.mxu2 }
 0x25f   :  { %v576_v62 = vadd.f32 %v575_v61, %v377_v55  ;;  %v588_v63 = vpop.f32.mrf.mxu3  ;;  %881 = vmatmul.bf16.vlgmr.msra.gmra.mxu1 %v609_v58 }
 0x260   :  { %v589_v0 = vadd.f32 %v588_v63, %v378_v57  ;;  %920 = vmatmul.bf16.vlgmr.msra.gmra.mxu0 %v612_v60  ;;  %v564_v1 = vpop.f32.mrf.mxu1 }
 0x261   :  { %v606_v2 = vmax.f32 %v576_v62, 0.0  ;;  %v603_v3 = vpop.f32.mrf.mxu0 }
 0x262   :  { %v607_v4 = vmax.f32 %v589_v0, 0.0 }
 0x263   :  { %v610_v5 = vpack.c.bf16 %v606_v2, %v606_v2 }
 0x264   :  { %v611_v6 = vpack.c.bf16 %v607_v4, %v607_v4 }
 0x265   :  { %894 = vmatmul.bf16.vlgmr.msra.gmra.mxu2 %v610_v5 }
 0x266   :  { %907 = vmatmul.bf16.vlgmr.msra.gmra.mxu3 %v611_v6  ;;  %v577_v7 = vpop.f32.mrf.mxu2 }
 0x267   :  { %v590_v48 = vpop.f32.mrf.mxu3 }
 0x2dc   :  { %v882_v8 = vpop.f32.mrf.mxu1 }
 0x2dd   :  { %v921_v59 = vpop.f32.mrf.mxu0  ;;  %v883_v12 = vadd.f32 %v1341_v9, %v882_v8 }
 0x2e4   :  { %v884_v10 = vpop.f32.mrf.mxu1 }
 0x2e5   :  { %v923_v11 = vpop.f32.mrf.mxu0 }
 0x2e8   :  { %v895_v13 = vpop.f32.mrf.mxu2 }
 0x2e9   :  { %v896_v14 = vadd.f32 %v895_v13, %v883_v12  ;;  %v908_v15 = vpop.f32.mrf.mxu3 }
 0x2eb   :  { %v909_v16 = vadd.f32 %v908_v15, %v896_v14 }
 0x2ed   :  { %v922_v17 = vadd.f32 %v921_v59, %v909_v16 }
 0x2ef   :  { %925 = vst [vmem:[#allocation7] sm:$0x3] %v922_v17 }
 0x2f0   :  { %v897_v18 = vpop.f32.mrf.mxu2  ;;  %936 = dma.vmem_to_hbm [thread:$0]  %s932_s10, 32, %s934_s13, [#allocation4]  }
 0x2f1   :  { %v910_v19 = vpop.f32.mrf.mxu3 }
 0x2f2   :  { %1418 = dma.done.wait [#allocation4], 32  }
 0x2f3   :  { %1419 = vsyncadd [#allocation4], 4294967264 }
 0x2f4   :  { %941 = vsyncpa [#allocation3], 1 }
 0x2f5   :  { %942 = vsyncpa [#allocation6], 1 }
 0x2f6   :  { %943 = vsyncpa [#allocation4], 1 }

</bundles_post_ra>
